<compile_context>
chip_gen: v5e
topology: v5e:2x2
jax: 0.10.0
libtpu: 0.0.40
codegen_flags: <defaults>
</compile_context>

<pallas_src>
import jax
import jax.numpy as jnp
from jax import lax
from jax.experimental import pallas as pl
from jax.experimental.pallas import tpu as pltpu

SLICE_START = 403                    # matches `nvB[:, 403:]` in the PyTorch module
LAMBDA = 2e-22                       # self.lambda_
REF_OFF = SLICE_START % 128          # 19 : reference column offset inside the slab
PEN_START = SLICE_START - REF_OFF    # 384: lane-aligned start of the penalty slab


def _criterion_kernel(params_ref, preds_ref, targets_ref, n_ref, v_ref, b_ref,
                      out_ref):
    # params (SMEM, f32[6]):
    #   [0] diff_outputs[0]  [1] min_values_outputs[0]
    #   [2] diff_outputs[1]  [3] min_values_outputs[1]
    #   [4] diff_inputs[2]   [5] min_values_inputs[2]
    #
    # preds_ref/targets_ref : [Bt*Co, L]      (sublane-dense, smooth-L1 term)
    # n_ref/v_ref/b_ref     : [Bt, L - 384]   (penalty slab only)
    # out_ref               : [1, 8, 128]     partial sums: [0,0,0]=sl1, [0,0,1]=penalty

    # ---- SmoothL1Loss (beta = 1.0), partial SUM for this batch tile ----
    p = preds_ref[...].astype(jnp.float32)
    t = targets_ref[...].astype(jnp.float32)
    d = p - t
    ad = jnp.abs(d)
    elem = jnp.where(ad < 1.0, 0.5 * d * d, ad - 0.5)
    sl1_sum = jnp.sum(elem)

    # ---- "constant nvB" penalty, computed only on the slab [:, PEN_START:] ----
    n = n_ref[...].astype(jnp.float32) * params_ref[0] + params_ref[1]
    v = v_ref[...].astype(jnp.float32) * params_ref[2] + params_ref[3]
    b = b_ref[...].astype(jnp.float32) * params_ref[4] + params_ref[5]
    n = jnp.exp(jnp.clip(n, 0.1, 25.0))
    # Parity with torch: no zero-guard on the de-normalised B field.
    nvB = n * v / b                                        # [Bt, L_pen]

    ref_col = nvB[:, REF_OFF:REF_OFF + 1]                  # original column 403
    diff = nvB - ref_col
    lane = lax.broadcasted_iota(jnp.int32, nvB.shape, dimension=1)
    pen_sum = jnp.sum(jnp.where(lane >= REF_OFF, diff * diff, 0.0))

    # ---- write partial sums into an aligned, lane-dense (8,128) tile ----
    row = lax.broadcasted_iota(jnp.int32, (8, 128), 0)
    col = lax.broadcasted_iota(jnp.int32, (8, 128), 1)
    out_ref[0] = jnp.where((row == 0) & (col == 0), sl1_sum,
                           jnp.where((row == 0) & (col == 1), pen_sum, 0.0))


def _pick_batch_tile(B, Co, L, L_pen, itemsize,
                     vmem_budget_bytes=10 * 1024 * 1024):
    """Largest batch tile (multiple of 8, or full B) whose double-buffered
    working set stays under a conservative VMEM budget (safe for v5e's 16 MiB
    default scoped VMEM and v7x's smaller physical VMEM)."""
    def step_bytes(bt):
        return (2 * bt * Co * L + 3 * bt * L_pen) * itemsize

    candidates = [bt for bt in range(8, B + 1, 8) if B % bt == 0]
    if B not in candidates:
        candidates.append(B)            # full-batch single block always legal
    candidates.sort()
    best = candidates[0]
    for bt in candidates:
        if 2 * step_bytes(bt) <= vmem_budget_bytes:
            best = bt
    return best


def custom_criterion(inputs, preds, targets,
                     diff_inputs, min_values_inputs,
                     diff_outputs, min_values_outputs,
                     lambda_=LAMBDA, batch_tile=None):
    B, Co, L = preds.shape
    if L <= SLICE_START:
        raise ValueError(f"length axis must exceed {SLICE_START}, got {L}")
    L_pen = L - PEN_START

    # Layout prep (cheap XLA slices / contiguous reshape; no dtype copies).
    preds_flat = preds.reshape(B * Co, L)
    targets_flat = targets.reshape(B * Co, L)
    n_slab = preds[:, 0, PEN_START:]          # only what the penalty reads
    v_slab = preds[:, 1, PEN_START:]
    b_slab = inputs[:, 2, PEN_START:]         # channel 2 only, slab lanes only

    params = jnp.stack([
        diff_outputs[0], min_values_outputs[0],
        diff_outputs[1], min_values_outputs[1],
        diff_inputs[2], min_values_inputs[2],
    ]).astype(jnp.float32)

    if batch_tile is None:
        batch_tile = _pick_batch_tile(B, Co, L, L_pen, preds.dtype.itemsize)
    Bt = batch_tile
    if B % Bt != 0:
        raise ValueError(f"batch {B} not divisible by batch_tile {Bt}")
    # TODO(synk): batches that are neither a multiple of 8 nor small enough to
    # fit as a single block fall back to one full-batch block (no padding path).
    nb = B // Bt

    partials = pl.pallas_call(
        _criterion_kernel,
        out_shape=jax.ShapeDtypeStruct((nb, 8, 128), jnp.float32),
        grid=(nb,),
        in_specs=[
            pl.BlockSpec(memory_space=pltpu.MemorySpace.SMEM),      # params
            pl.BlockSpec((Bt * Co, L), lambda i: (i, 0)),           # preds_flat
            pl.BlockSpec((Bt * Co, L), lambda i: (i, 0)),           # targets_flat
            pl.BlockSpec((Bt, L_pen), lambda i: (i, 0)),            # n slab
            pl.BlockSpec((Bt, L_pen), lambda i: (i, 0)),            # v slab
            pl.BlockSpec((Bt, L_pen), lambda i: (i, 0)),            # B-field slab
        ],
        out_specs=pl.BlockSpec((1, 8, 128), lambda i: (i, 0, 0)),
        compiler_params=pltpu.CompilerParams(
            dimension_semantics=("parallel",)),
    )(params, preds_flat, targets_flat, n_slab, v_slab, b_slab)

    sl1_total = jnp.sum(partials[:, 0, 0])
    pen_total = jnp.sum(partials[:, 0, 1])
    count = jnp.float32(B * Co * L)
    return sl1_total / count + pen_total * jnp.float32(lambda_)


def _reference(inputs, preds, targets,
               diff_inputs, min_values_inputs,
               diff_outputs, min_values_outputs,
               lambda_=LAMBDA):
    d = preds - targets
    ad = jnp.abs(d)
    sl1 = jnp.mean(jnp.where(ad < 1.0, 0.5 * d * d, ad - 0.5))
    n = preds[:, 0, :] * diff_outputs[0] + min_values_outputs[0]
    v = preds[:, 1, :] * diff_outputs[1] + min_values_outputs[1]
    b = inputs[:, 2, :] * diff_inputs[2] + min_values_inputs[2]
    n = jnp.exp(jnp.clip(n, 0.1, 25.0))
    nvB = (n * v / b)[:, SLICE_START:]
    pen = jnp.sum(jnp.abs(nvB - nvB[:, :1]) ** 2) * lambda_
    return sl1 + pen


if __name__ == "__main__":
    key = jax.random.PRNGKey(0)
    kxt, kyt, kin, kpr, ktg = jax.random.split(key, 5)

    # Small shapes consistent with the forward (L must exceed 403 for the slice).
    B, CI, CO, L = 16, 4, 2, 512

    # Synthetic "training set" statistics (positive-valued so the B field != 0).
    X_train = jax.random.uniform(kxt, (8, CI, L), jnp.float32, 0.5, 2.0)
    y_train = jax.random.uniform(kyt, (8, CO, L), jnp.float32, 0.1, 1.0)

    max_values_inputs = X_train.max(axis=2).max(axis=0)
    min_values_inputs = X_train.min(axis=2).min(axis=0)
    diff_inputs = max_values_inputs - min_values_inputs

    max_values_outputs = y_train.max(axis=2).max(axis=0)
    min_values_outputs = y_train.min(axis=2).min(axis=0)
    diff_outputs = max_values_outputs - min_values_outputs

    # Example (normalised) inputs / preds / targets.
    inputs = jax.random.uniform(kin, (B, CI, L), jnp.float32)
    preds = jax.random.uniform(kpr, (B, CO, L), jnp.float32)
    targets = jax.random.uniform(ktg, (B, CO, L), jnp.float32)

    ref = jax.block_until_ready(
        _reference(inputs, preds, targets,
                   diff_inputs, min_values_inputs,
                   diff_outputs, min_values_outputs))

    # Gridded path (2 batch tiles -> pipelined DMA, megacore-shardable).
    loss_tiled = jax.block_until_ready(
        custom_criterion(inputs, preds, targets,
                         diff_inputs, min_values_inputs,
                         diff_outputs, min_values_outputs,
                         batch_tile=8))
    # Auto-picked tile path (single block for these small shapes).
    loss_auto = jax.block_until_ready(
        custom_criterion(inputs, preds, targets,
                         diff_inputs, min_values_inputs,
                         diff_outputs, min_values_outputs))

    assert jnp.isfinite(loss_tiled) and jnp.isfinite(loss_auto), \
        "kernel produced non-finite loss"
    assert jnp.allclose(loss_tiled, ref, rtol=1e-5, atol=1e-6), (loss_tiled, ref)
    assert jnp.allclose(loss_auto, ref, rtol=1e-5, atol=1e-6), (loss_auto, ref)
    print("KERNEL_OK")
</pallas_src>

<mosaic_0001>
module attributes {stable_mosaic.version = 11 : i64} {
  func.func @_criterion_kernel(%arg0: i32, %arg1: memref<6xf32, #tpu.memory_space<smem>>, %arg2: memref<16x512xf32, #tpu.memory_space<vmem>>, %arg3: memref<16x512xf32, #tpu.memory_space<vmem>>, %arg4: memref<8x128xf32, #tpu.memory_space<vmem>>, %arg5: memref<8x128xf32, #tpu.memory_space<vmem>>, %arg6: memref<8x128xf32, #tpu.memory_space<vmem>>, %arg7: memref<1x8x128xf32, #tpu.memory_space<vmem>>) attributes {dimension_semantics = [#tpu.dimension_semantics<parallel>], iteration_bounds = array<i64: 2>, scalar_prefetch = 0 : i64, scratch_operands = 0 : i64, tpu.core_type = #tpu.core_type<tc>, window_params = [{transform_indices = @transform_0, window_bounds = array<i64: 6>}, {transform_indices = @transform_1, window_bounds = array<i64: 16, 512>}, {transform_indices = @transform_2, window_bounds = array<i64: 16, 512>}, {transform_indices = @transform_3, window_bounds = array<i64: 8, 128>}, {transform_indices = @transform_4, window_bounds = array<i64: 8, 128>}, {transform_indices = @transform_5, window_bounds = array<i64: 8, 128>}, {transform_indices = @transform_6, window_bounds = array<i64: 1, 8, 128>}]} {
    %c0 = arith.constant 0 : index
    %c0_0 = arith.constant 0 : index
    %0 = vector.load %arg2[%c0, %c0_0] : memref<16x512xf32, #tpu.memory_space<vmem>>, vector<16x512xf32>
    %c0_1 = arith.constant 0 : index
    %c0_2 = arith.constant 0 : index
    %1 = vector.load %arg3[%c0_1, %c0_2] : memref<16x512xf32, #tpu.memory_space<vmem>>, vector<16x512xf32>
    %2 = arith.subf %0, %1 : vector<16x512xf32>
    %3 = math.absf %2 : vector<16x512xf32>
    %cst = arith.constant 1.000000e+00 : f32
    %4 = vector.broadcast %cst : f32 to vector<16x512xf32>
    %5 = arith.cmpf olt, %3, %4 : vector<16x512xf32>
    %cst_3 = arith.constant 5.000000e-01 : f32
    %6 = vector.broadcast %cst_3 : f32 to vector<16x512xf32>
    %7 = arith.mulf %6, %2 : vector<16x512xf32>
    %8 = arith.mulf %7, %2 : vector<16x512xf32>
    %cst_4 = arith.constant 5.000000e-01 : f32
    %9 = vector.broadcast %cst_4 : f32 to vector<16x512xf32>
    %10 = arith.subf %3, %9 : vector<16x512xf32>
    %11 = arith.select %5, %8, %10 : vector<16x512xi1>, vector<16x512xf32>
    %12 = vector.shape_cast %11 : vector<16x512xf32> to vector<1x16x512xf32>
    %cst_5 = arith.constant dense<0.000000e+00> : vector<1xf32>
    %13 = vector.multi_reduction <add>, %12, %cst_5 [1, 2] : vector<1x16x512xf32> to vector<1xf32>
    %14 = vector.shape_cast %13 : vector<1xf32> to vector<1x1x1xf32>
    %15 = vector.extract %14[0, 0, 0] : f32 from vector<1x1x1xf32>
    %c0_6 = arith.constant 0 : index
    %c0_7 = arith.constant 0 : index
    %16 = vector.load %arg4[%c0_6, %c0_7] : memref<8x128xf32, #tpu.memory_space<vmem>>, vector<8x128xf32>
    %c0_8 = arith.constant 0 : index
    %17 = memref.load %arg1[%c0_8] : memref<6xf32, #tpu.memory_space<smem>>
    %18 = vector.broadcast %17 : f32 to vector<8x128xf32>
    %19 = arith.mulf %16, %18 : vector<8x128xf32>
    %c1 = arith.constant 1 : index
    %20 = memref.load %arg1[%c1] : memref<6xf32, #tpu.memory_space<smem>>
    %21 = vector.broadcast %20 : f32 to vector<8x128xf32>
    %22 = arith.addf %19, %21 : vector<8x128xf32>
    %c0_9 = arith.constant 0 : index
    %c0_10 = arith.constant 0 : index
    %23 = vector.load %arg5[%c0_9, %c0_10] : memref<8x128xf32, #tpu.memory_space<vmem>>, vector<8x128xf32>
    %c2 = arith.constant 2 : index
    %24 = memref.load %arg1[%c2] : memref<6xf32, #tpu.memory_space<smem>>
    %25 = vector.broadcast %24 : f32 to vector<8x128xf32>
    %26 = arith.mulf %23, %25 : vector<8x128xf32>
    %c3 = arith.constant 3 : index
    %27 = memref.load %arg1[%c3] : memref<6xf32, #tpu.memory_space<smem>>
    %28 = vector.broadcast %27 : f32 to vector<8x128xf32>
    %29 = arith.addf %26, %28 : vector<8x128xf32>
    %c0_11 = arith.constant 0 : index
    %c0_12 = arith.constant 0 : index
    %30 = vector.load %arg6[%c0_11, %c0_12] : memref<8x128xf32, #tpu.memory_space<vmem>>, vector<8x128xf32>
    %c4 = arith.constant 4 : index
    %31 = memref.load %arg1[%c4] : memref<6xf32, #tpu.memory_space<smem>>
    %32 = vector.broadcast %31 : f32 to vector<8x128xf32>
    %33 = arith.mulf %30, %32 : vector<8x128xf32>
    %c5 = arith.constant 5 : index
    %34 = memref.load %arg1[%c5] : memref<6xf32, #tpu.memory_space<smem>>
    %35 = vector.broadcast %34 : f32 to vector<8x128xf32>
    %36 = arith.addf %33, %35 : vector<8x128xf32>
    %cst_13 = arith.constant 1.000000e-01 : f32
    %cst_14 = arith.constant 2.500000e+01 : f32
    %37 = vector.broadcast %cst_13 : f32 to vector<8x128xf32>
    %38 = arith.maximumf %37, %22 : vector<8x128xf32>
    %39 = vector.broadcast %cst_14 : f32 to vector<8x128xf32>
    %40 = arith.minimumf %39, %38 : vector<8x128xf32>
    %41 = math.exp %40 : vector<8x128xf32>
    %42 = arith.mulf %41, %29 : vector<8x128xf32>
    %43 = arith.divf %42, %36 : vector<8x128xf32>
    %44 = vector.extract_strided_slice %43 {offsets = [0, 19], sizes = [8, 1], strides = [1, 1]} : vector<8x128xf32> to vector<8x1xf32>
    %45 = vector.broadcast %44 : vector<8x1xf32> to vector<8x128xf32>
    %46 = arith.subf %43, %45 : vector<8x128xf32>
    %47 = tpu.iota {dimensions = array<i32: 1>} : vector<8x128xi32>
    %c19_i32 = arith.constant 19 : i32
    %48 = vector.broadcast %c19_i32 : i32 to vector<8x128xi32>
    %49 = arith.cmpi sge, %47, %48 : vector<8x128xi32>
    %50 = arith.mulf %46, %46 : vector<8x128xf32>
    %cst_15 = arith.constant 0.000000e+00 : f32
    %51 = vector.broadcast %cst_15 : f32 to vector<8x128xf32>
    %52 = arith.select %49, %50, %51 : vector<8x128xi1>, vector<8x128xf32>
    %53 = vector.shape_cast %52 : vector<8x128xf32> to vector<1x8x128xf32>
    %cst_16 = arith.constant dense<0.000000e+00> : vector<1xf32>
    %54 = vector.multi_reduction <add>, %53, %cst_16 [1, 2] : vector<1x8x128xf32> to vector<1xf32>
    %55 = vector.shape_cast %54 : vector<1xf32> to vector<1x1x1xf32>
    %56 = vector.extract %55[0, 0, 0] : f32 from vector<1x1x1xf32>
    %57 = tpu.iota {dimensions = array<i32: 0>} : vector<8x128xi32>
    %58 = tpu.iota {dimensions = array<i32: 1>} : vector<8x128xi32>
    %c0_i32 = arith.constant 0 : i32
    %59 = vector.broadcast %c0_i32 : i32 to vector<8x128xi32>
    %60 = arith.cmpi eq, %57, %59 : vector<8x128xi32>
    %c0_i32_17 = arith.constant 0 : i32
    %61 = vector.broadcast %c0_i32_17 : i32 to vector<8x128xi32>
    %62 = arith.cmpi eq, %58, %61 : vector<8x128xi32>
    %63 = arith.andi %60, %62 : vector<8x128xi1>
    %c0_i32_18 = arith.constant 0 : i32
    %64 = vector.broadcast %c0_i32_18 : i32 to vector<8x128xi32>
    %65 = arith.cmpi eq, %57, %64 : vector<8x128xi32>
    %c1_i32 = arith.constant 1 : i32
    %66 = vector.broadcast %c1_i32 : i32 to vector<8x128xi32>
    %67 = arith.cmpi eq, %58, %66 : vector<8x128xi32>
    %68 = arith.andi %65, %67 : vector<8x128xi1>
    %cst_19 = arith.constant 0.000000e+00 : f32
    %69 = vector.broadcast %56 : f32 to vector<8x128xf32>
    %70 = vector.broadcast %cst_19 : f32 to vector<8x128xf32>
    %71 = arith.select %68, %69, %70 : vector<8x128xi1>, vector<8x128xf32>
    %72 = vector.broadcast %15 : f32 to vector<8x128xf32>
    %73 = arith.select %63, %72, %71 : vector<8x128xi1>, vector<8x128xf32>
    %c0_20 = arith.constant 0 : index
    %c0_21 = arith.constant 0 : index
    %c0_22 = arith.constant 0 : index
    %74 = vector.load %arg7[%c0_20, %c0_21, %c0_22] : memref<1x8x128xf32, #tpu.memory_space<vmem>>, vector<1x8x128xf32>
    %75 = vector.shape_cast %74 : vector<1x8x128xf32> to vector<8x128xf32>
    %76 = vector.shape_cast %73 : vector<8x128xf32> to vector<1x8x128xf32>
    tpu.vector_store %arg7[%c0_20, %c0_21, %c0_22], %76 {strides = array<i32>} : memref<1x8x128xf32, #tpu.memory_space<vmem>>, vector<1x8x128xf32>,
    return
  }
  func.func @transform_0(%arg0: i32) -> i32 {
    %c0_i32 = arith.constant 0 : i32
    %c0_i32_0 = arith.constant 0 : i32
    return %c0_i32 : i32
  }
  func.func @transform_1(%arg0: i32) -> (i32, i32) {
    %c0_i32 = arith.constant 0 : i32
    %c0_i32_0 = arith.constant 0 : i32
    return %arg0, %c0_i32 : i32, i32
  }
  func.func @transform_2(%arg0: i32) -> (i32, i32) {
    %c0_i32 = arith.constant 0 : i32
    %c0_i32_0 = arith.constant 0 : i32
    return %arg0, %c0_i32 : i32, i32
  }
  func.func @transform_3(%arg0: i32) -> (i32, i32) {
    %c0_i32 = arith.constant 0 : i32
    %c0_i32_0 = arith.constant 0 : i32
    return %arg0, %c0_i32 : i32, i32
  }
  func.func @transform_4(%arg0: i32) -> (i32, i32) {
    %c0_i32 = arith.constant 0 : i32
    %c0_i32_0 = arith.constant 0 : i32
    return %arg0, %c0_i32 : i32, i32
  }
  func.func @transform_5(%arg0: i32) -> (i32, i32) {
    %c0_i32 = arith.constant 0 : i32
    %c0_i32_0 = arith.constant 0 : i32
    return %arg0, %c0_i32 : i32, i32
  }
  func.func @transform_6(%arg0: i32) -> (i32, i32, i32) {
    %c0_i32 = arith.constant 0 : i32
    %c0_i32_0 = arith.constant 0 : i32
    %c0_i32_1 = arith.constant 0 : i32
    return %arg0, %c0_i32, %c0_i32_0 : i32, i32, i32
  }
}

</mosaic_0001>

<bundles_post_ra>
// kernel: tpu_custom_call.1
= control target key start
LH: loop header
LB: loop body
LE: loop exit
PB: predicated region body
PF: predicated region fallthrough
CT: control target
= control target key end

     0   :  { %s1527_s0 = inlined_call_operand.hbm [shape: f32[6], index: 0, kind: input, shape index: {}]   ;;  %s1528_s1 = inlined_call_operand.hbm [shape: f32[32,512], index: 1, kind: input, shape index: {}]   ;;  %s1529_s2 = inlined_call_operand.hbm [shape: f32[32,512], index: 2, kind: input, shape index: {}]   ;;  %s1530_s3 = inlined_call_operand.hbm [shape: f32[16,128], index: 3, kind: input, shape index: {}]   ;;  %s1531_s4 = inlined_call_operand.hbm [shape: f32[16,128], index: 4, kind: input, shape index: {}]   ;;  %s1532_s5 = inlined_call_operand.hbm [shape: f32[16,128], index: 5, kind: input, shape index: {}]   ;;  %s1533_s6 = inlined_call_operand.hbm [shape: f32[2,8,128], index: 6, kind: output, shape index: {}]  }
   0x1   :  { %1543 = sst [smem:[#allocation23_spill]] %s1527_s0 }
   0x2   :  { %1544 = sst [smem:[#allocation24_spill]] %s1528_s1 }
   0x3   :  { %1545 = sst [smem:[#allocation25_spill]] %s1529_s2 }
   0x4   :  { %1546 = sst [smem:[#allocation26_spill]] %s1531_s4 }
   0x5   :  { %11 = vsyncpa [#allocation5], 0 }
   0x6   :  { %12 = vsyncpa [#allocation3], 0 }
   0x7   :  { %14 = vsyncpa [#allocation3 + $0x1], 0 }
   0x8   :  { %15 = vsyncpa [#allocation8], 0 }
   0x9   :  { %17 = vsyncpa [#allocation8 + $0x1], 0 }
   0xa   :  { %18 = vsyncpa [#allocation11], 0 }
   0xb   :  { %20 = vsyncpa [#allocation11 + $0x1], 0 }
   0xc   :  { %21 = vsyncpa [#allocation4], 0 }
   0xd   :  { %23 = vsyncpa [#allocation4 + $0x1], 0  ;;  %s1208_s21 = smov 0   ;;  %s1210_s22 = smov 0  }
   0xe   :  { %s1212_s23 = smov 0   ;;  %s1214_s24 = smov 0  }
   0xf LB: > { %1547 = sst [smem:[#allocation19_spill]] %s1163_s23  ;;  %s1229_s25 = sadd.s32 1, %s1167_s24   ;;  %s1167_s24 = sphi %s1214_s24, %s1581_s24   ;;  %s1163_s23 = sphi %s1212_s23, %s1583_s23   ;;  %s1159_s22 = sphi %s1210_s22, %s1585_s22   ;;  %s1155_s21 = sphi %s1208_s21, %s1584_s21  }
  0x10   : > { %1548 = sst [smem:[#allocation20_spill]] %s1229_s25  ;;  %s57_s26 = sadd.s32 1, %s1163_s23 }
  0x11   : > { %s54_s27 = ssub.s32 %s1167_s24, %s1229_s25  ;;  %p64_p0 = scmp.ne.s32.totalorder %s1163_s23, %s1159_s22 }
  0x12   : > { %p55_p1 = scmp.eq.s32.totalorder %s54_s27, 0  ;;  %p65_p2 = scmp.eq.s32.totalorder %s1167_s24, 0 }
  0x13   : > { %p880_p4 = scmp.lt.s32.totalorder %s1167_s24, 2  ;;  %s1246_s29 = sand.u32 1, %s1163_s23  }
  0x14   : > { %s1240_s28 = scalar_select %p55_p1, %s1163_s23, %s57_s26  }
  0x15   : > { %p66_p5 = por %p65_p2, %p64_p0  ;;  %s1534_s30 = sshll.u32 %s1246_s29, 6 }
  0x16   : > { %1549 = sst [smem:[#allocation21_spill]] %s1240_s28  ;;  %s1535_s7 = sshll.u32 %s1167_s24, 6 }
  0x17   : > { %p1250_p6 = pnand %p880_p4, %p66_p5  ;;  %s257_s9 = sand.u32 1, %s1167_s24  }
  0x18   : > { %s1551_s2 = sld [smem:[#allocation25_spill]]  ;;  %s261_s14 = scalar_lea.vmem [#allocation7], %s1534_s30 }
  0x19   : > { %s270_s15 = sshll.u32 %s261_s14, 4  ;;  %s1264_s16 = scalar_lea.sflag [#allocation8], %s257_s9  ;;  %s271_s15 = int_to_ptr.vmem [resolvable:$true] %s270_s15 }
  0x1a   : > { %p1268_p8 = pneg %p1250_p6 }
  0x1e   : > { %s267_s12 = scalar_lea.hbm %s1551_s2, %s1535_s7  ;;  %s931_s27 = scalar_lea.hbm %s1551_s2, 128 }
  0x1f   : > { %s268_s13 = sshll.u32 %s267_s12, 4  ;;  %s269_s13 = int_to_ptr.hbm [resolvable:$true] %s268_s13 }
  0x20   : > { %s924_s17 = sshra.s32 %s269_s13, 4  ;;  %s925_s17 = int_to_ptr.hbm [resolvable:$true] %s924_s17 }
  0x21   : > { %s926_s18 = scalar_lea.hbm %s925_s17, 64  ;;  %p932_p11 = scmp.lt.s32.totalorder %s925_s17, %s1551_s2 }
  0x22   : > { %p927_p7 = scmp.ne.s32.totalorder %s925_s17, %s926_s18  ;;  %p933_p12 = scmp.lt.s32.totalorder %s931_s27, %s926_s18 }
  0x24   : > { %p929_p9 = pnand %p1268_p8, %p927_p7  ;;  %p934_p13 = por %p933_p12, %p932_p11 }
  0x26   : > { %p930_p10 = pneg %p929_p9 }
  0x28   : > { %p935_p1 = pnand %p934_p13, %p930_p10 }
  0x2a   : > { %938 = shalt.err (!%p935_p1)
}
  0x2b   : > { %s1536_s12 = smov 512   ;;  %s1537_s14 = smov 32  }
  0x2c   : > { %865 = dma.hbm_to_vmem [thread:$0]  (!%p1250_p6), %s269_s13, 1024, %s271_s15, %s1264_s16, %s1536_s12, %s1536_s12, %s1537_s14  }
  0x2d   : > { %s1287_s20 = sshll.u32 %s1246_s29, 3  ;;  %s1290_s17 = sshll.u32 %s1167_s24, 3 }
  0x2e   : > { %s1553_s4 = sld [smem:[#allocation26_spill]]  ;;  %s303_s10 = scalar_lea.vmem [#allocation10], %s1287_s20 }
  0x2f   : > { %s311_s11 = sshll.u32 %s303_s10, 4  ;;  %s1299_s7 = scalar_lea.sflag [#allocation11], %s257_s9  ;;  %s312_s11 = int_to_ptr.vmem [resolvable:$true] %s311_s11 }
  0x34   : > { %s307_s27 = scalar_lea.hbm %s1553_s4, %s1290_s17  ;;  %s961_s18 = scalar_lea.hbm %s1553_s4, 16 }
  0x35   : > { %s309_s30 = sshll.u32 %s307_s27, 4  ;;  %s310_s30 = int_to_ptr.hbm [resolvable:$true] %s309_s30 }
  0x36   : > { %s954_s2 = sshra.s32 %s310_s30, 4  ;;  %s955_s2 = int_to_ptr.hbm [resolvable:$true] %s954_s2 }
  0x37   : > { %s956_s13 = scalar_lea.hbm %s955_s2, 8  ;;  %p962_p7 = scmp.lt.s32.totalorder %s955_s2, %s1553_s4 }
  0x38   : > { %p957_p2 = scmp.ne.s32.totalorder %s955_s2, %s956_s13  ;;  %p963_p9 = scmp.lt.s32.totalorder %s961_s18, %s956_s13 }
  0x3a   : > { %p959_p4 = pnand %p957_p2, %p1268_p8  ;;  %p964_p10 = por %p963_p9, %p962_p7 }
  0x3c   : > { %p960_p5 = pneg %p959_p4 }
  0x3e   : > { %p965_p11 = pnand %p964_p10, %p960_p5 }
  0x40   : > { %968 = shalt.err (!%p965_p11)
}
  0x41   : > { %871 = dma.hbm_to_vmem [thread:$0]  (!%p1250_p6), %s310_s30, 128, %s312_s11, %s1299_s7  }
  0x42   : > { %s1313_s9 = sadd.s32 4294967295, %s1167_s24   ;;  %s788_s2 = sadd.s32 4294967294, %s1167_s24  }
  0x43   : > { %p70_p12 = scmp.ne.s32.totalorder %s1159_s22, %s1155_s21  ;;  %p1542_p13 = scmp.eq.s32.totalorder %s1313_s9, 0 }
  0x44   : > { %p198_p1 = scmp.eq.s32.totalorder %s1313_s9, 1  ;;  %p204_p2 = scmp.eq.s32.totalorder %s788_s2, 1 }
  0x45   : > { %p789_p4 = scmp.ge.s32.totalorder %s1167_s24, 1  ;;  %p1323_p5 = por %p1542_p13, %p70_p12 }
  0x46   : > { %p1330_p7 = por %p198_p1, %p64_p0  ;;  %p1334_p9 = por %p204_p2, %p70_p12 }
  0x47   : > { %p211_p10 = scmp.lt.s32.totalorder %s1167_s24, 3  ;;  %s1558_s0 = sld [smem:[#allocation23_spill]] }
  0x48   : > { %s1556_s14 = scalar_select %p1334_p9, 1, 0 }
  0x49   : > { %p1342_p11 = pnand %p789_p4, %p211_p10  ;;  %s1560_s15 = sshll.u32 %s1167_s24, 6 }
  0x4a   : > { %1557 = sst [smem:[#allocation22_spill]] %s1556_s14  ;;  %s1562_s4 = sshll.u32 %s1246_s29, 6 }
  0x4b   : > { %p855_p0 = pneg %p1342_p11  ;;  %s1561_s1 = sld [smem:[#allocation24_spill]] }
  0x4c   : > { %s238_s28 = scalar_lea.vmem [#allocation6], %s1562_s4  ;;  %s1171_s10 = smov [#allocation2]  }
  0x4d   : > { %s223_s11 = sshll.u32 %s1558_s0, 4  ;;  %s247_s23 = sshll.u32 %s238_s28, 4  ;;  %s224_s11 = int_to_ptr.hbm [resolvable:$true] %s223_s11  ;;  %s248_s23 = int_to_ptr.vmem [resolvable:$true] %s247_s23 }
  0x4e   : > { %p856_p12 = pnand %p855_p0, %p1542_p13  ;;  %s235_s0 = scalar_lea.sflag [#allocation3], %s1246_s29 }
  0x50   : > { %858 = dma.hbm_to_smem (!%p856_p12), %s224_s11, 16, %s1171_s10, [#allocation5]  }
  0x51   : > { %s244_s2 = scalar_lea.hbm %s1561_s1, %s1560_s15  ;;  %s1006_s4 = scalar_lea.hbm %s1561_s1, 128 }
  0x52   : > { %s245_s27 = sshll.u32 %s244_s2, 4  ;;  %s246_s27 = int_to_ptr.hbm [resolvable:$true] %s245_s27 }
  0x53   : > { %s999_s25 = sshra.s32 %s246_s27, 4  ;;  %s1000_s25 = int_to_ptr.hbm [resolvable:$true] %s999_s25 }
  0x54   : > { %s1001_s14 = scalar_lea.hbm %s1000_s25, 64  ;;  %p1007_p10 = scmp.lt.s32.totalorder %s1000_s25, %s1561_s1 }
  0x55   : > { %p1002_p1 = scmp.ne.s32.totalorder %s1000_s25, %s1001_s14  ;;  %p1008_p0 = scmp.lt.s32.totalorder %s1006_s4, %s1001_s14 }
  0x57   : > { %p1004_p2 = pnand %p1002_p1, %p1268_p8  ;;  %p1009_p3 = por %p1008_p0, %p1007_p10 }
  0x59   : > { %p1005_p4 = pneg %p1004_p2 }
  0x5b   : > { %p1010_p13 = pnand %p1009_p3, %p1005_p4 }
  0x5d   : > { %1013 = shalt.err (!%p1010_p13)
}
  0x5e   : > { %s1563_s29 = smov 32   ;;  %s1564_s11 = smov 512  }
  0x5f   : > { %862 = dma.hbm_to_vmem [thread:$0]  (!%p1250_p6), %s246_s27, 1024, %s248_s23, %s235_s0, %s1564_s11, %s1564_s11, %s1563_s29  }
  0x60   : > { %s288_s18 = scalar_lea.hbm %s1530_s3, %s1290_s17  ;;  %s284_s15 = scalar_lea.vmem [#allocation9], %s1287_s20 }
  0x61   : > { %s292_s28 = sshll.u32 %s284_s15, 4  ;;  %s290_s25 = sshll.u32 %s288_s18, 4  ;;  %s293_s28 = int_to_ptr.vmem [resolvable:$true] %s292_s28  ;;  %s291_s25 = int_to_ptr.hbm [resolvable:$true] %s290_s25 }
  0x62   : > { %s1029_s14 = sshra.s32 %s291_s25, 4  ;;  %s1036_s0 = scalar_lea.hbm %s1530_s3, 16  ;;  %s1030_s14 = int_to_ptr.hbm [resolvable:$true] %s1029_s14 }
  0x63   : > { %s1031_s4 = scalar_lea.hbm %s1030_s14, 8  ;;  %p1037_p1 = scmp.lt.s32.totalorder %s1030_s14, %s1530_s3 }
  0x64   : > { %p1032_p3 = scmp.ne.s32.totalorder %s1030_s14, %s1031_s4  ;;  %p1038_p2 = scmp.lt.s32.totalorder %s1036_s0, %s1031_s4 }
  0x66   : > { %p1034_p13 = pnand %p1032_p3, %p1268_p8  ;;  %p1039_p4 = por %p1038_p2, %p1037_p1 }
  0x68   : > { %p1035_p12 = pneg %p1034_p13 }
  0x6a   : > { %p1040_p10 = pnand %p1039_p4, %p1035_p12 }
  0x6c   : > { %1043 = shalt.err (!%p1040_p10)
}
  0x6d   : > { %868 = dma.hbm_to_vmem [thread:$0]  (!%p1250_p6), %s291_s25, 128, %s293_s28, %s1264_s16  }
  0x6e   : > { %s326_s1 = scalar_lea.hbm %s1532_s5, %s1290_s17  ;;  %s322_s2 = scalar_lea.vmem [#allocation12], %s1287_s20 }
  0x6f   : > { %s330_s10 = sshll.u32 %s322_s2, 4  ;;  %s328_s18 = sshll.u32 %s326_s1, 4  ;;  %s331_s10 = int_to_ptr.vmem [resolvable:$true] %s330_s10  ;;  %s329_s18 = int_to_ptr.hbm [resolvable:$true] %s328_s18 }
  0x70   : > { %s1059_s15 = sshra.s32 %s329_s18, 4  ;;  %s1066_s16 = scalar_lea.hbm %s1532_s5, 16  ;;  %s1060_s15 = int_to_ptr.hbm [resolvable:$true] %s1059_s15 }
  0x71   : > { %s1061_s14 = scalar_lea.hbm %s1060_s15, 8  ;;  %p1067_p12 = scmp.lt.s32.totalorder %s1060_s15, %s1532_s5 }
  0x72   : > { %p1062_p0 = scmp.ne.s32.totalorder %s1060_s15, %s1061_s14  ;;  %p1068_p1 = scmp.lt.s32.totalorder %s1066_s16, %s1061_s14 }
  0x74   : > { %p1064_p3 = pnand %p1062_p0, %p1268_p8  ;;  %p1069_p2 = por %p1068_p1, %p1067_p12 }
  0x76   : > { %p1065_p13 = pneg %p1064_p3 }
  0x78   : > { %p1070_p4 = pnand %p1069_p2, %p1065_p13 }
  0x7a   : > { %1073 = shalt.err (!%p1070_p4)
}
  0x7b   : > { %874 = dma.hbm_to_vmem [thread:$0]  (!%p1250_p6), %s329_s18, 128, %s331_s10, %s1299_s7  }
  0x7c   : > { %339 = sbr.rel (%p1342_p11) target bundleno = 478 (0x1de), region = 44  ;;  %p1565_p8 = scmp.eq.s32.totalorder (!%p1342_p11), %s1313_s9, 0 }
  0x81   : > { %1134 = dma.done.wait (%p1565_p8), [#allocation5], 16   ;;  %p1566_p10 = pmov %p1565_p8 }
  0x82   : > { %s1410_s19 = sand.u32 1, %s1159_s22  }
  0x83   : > { %1136 = vsyncadd (%p1566_p10), [#allocation5], 4294967280  ;;  %s808_s20 = sshll.u32 %s1410_s19, 6  ;;  %s347_s17 = scalar_lea.sflag [#allocation3], %s1410_s19 }
  0x84   : > { %s1414_s8 = scalar_lea.vmem [#allocation6], %s808_s20 }
  0x85   : > { %1138 = dma.done.wait (%p1323_p5), %s347_s17, 1024  }
  0x86   : > { %1140 = vsyncadd (%p1323_p5), %s347_s17, 4294966272  ;;  %s356_s7 = sand.u32 1, %s1313_s9   ;;  %s1421_s0 = scalar_lea.vmem [#allocation7], %s808_s20 }
  0x87   : > { %s357_s13 = scalar_lea.sflag [#allocation8], %s356_s7 }
  0x88   : > { %1142 = dma.done.wait (%p1323_p5), %s357_s13, 1152  }
  0x89   : > { %1144 = vsyncadd (%p1323_p5), %s357_s13, 4294966144  ;;  %s1428_s23 = sshll.u32 %s1410_s19, 3  ;;  %s377_s29 = scalar_lea.sflag [#allocation11], %s356_s7 }
  0x8a   : > { %s370_s27 = scalar_lea.vmem [#allocation9], %s1428_s23  ;;  %s380_s11 = scalar_lea.vmem [#allocation10], %s1428_s23 }
  0x8b   : > { %1146 = dma.done.wait (%p1323_p5), %s377_s29, 256  }
  0x8c   : > { %1148 = vsyncadd (%p1323_p5), %s377_s29, 4294967040  ;;  %s390_s1 = scalar_lea.vmem [#allocation12], %s1428_s23 }
  0x8d   : > { %396 = sfence }
  0x8e   : > { %s532_s2 = sld [smem:[#allocation2]]  ;;  %v1172_v0 = vmov 19   ;;  %v531_v1 = vld [vmem:[%s370_s27] sm:$0xff]  ;;  %v538_v14 = vld [vmem:[%s380_s11] sm:$0xff]  ;;  %s828_s4 = sshll.u32 %s1313_s9, 3 }
  0x8f   : > { %919 = vset.pattern.permute.xlu0 %v1172_v0  ;;  %s822_s10 = sld [smem:[#allocation2 + $0x1]]  ;;  %v545_v5 = vld [vmem:[%s390_s1] sm:$0xff]  ;;  %v445_v37 = vld [vmem:[%s1414_s8 + $0x10] sm:$0xff]  ;;  %v446_v43 = vld [vmem:[%s1414_s8 + $0x18] sm:$0xff]  ;;  %s615_s28 = scalar_lea.hbm %s1533_s6, %s828_s4 }
  0x90   : > { %s825_s18 = sld [smem:[#allocation2 + $0x4]]  ;;  %v443_v32 = vld [vmem:[%s1414_s8] sm:$0xff]  ;;  %v444_v33 = vld [vmem:[%s1414_s8 + $0x8] sm:$0xff]  ;;  %v453_v38 = vld [vmem:[%s1421_s0 + $0x10] sm:$0xff]  ;;  %s440_s25 = scalar_lea.vmem [#allocation13], %s1428_s23 }
  0x91   : > { %s826_s15 = sld [smem:[#allocation2 + $0x5]]  ;;  %v451_v34 = vld [vmem:[%s1421_s0] sm:$0xff]  ;;  %v452_v35 = vld [vmem:[%s1421_s0 + $0x8] sm:$0xff]  ;;  %v461_v40 = vsub.f32 %v445_v37, %v453_v38  ;;  %v454_v44 = vld [vmem:[%s1421_s0 + $0x18] sm:$0xff]  ;;  %s617_s20 = sshll.u32 %s440_s25, 4  ;;  %s618_s20 = int_to_ptr.vmem [resolvable:$true] %s617_s20 }
  0x92   : > { %s823_s14 = sld [smem:[#allocation2 + $0x2]]  ;;  %v459_v36 = vsub.f32 %v443_v32, %v451_v34  ;;  %v460_v39 = vsub.f32 %v444_v33, %v452_v35  ;;  %v462_v47 = vsub.f32 %v446_v43, %v454_v44  ;;  %v447_v51 = vld [vmem:[%s1414_s8 + $0x20] sm:$0xff]  ;;  %v448_v61 = vld [vmem:[%s1414_s8 + $0x28] sm:$0xff]  ;;  %s605_s9 = scalar_lea.sflag [#allocation4], %s1410_s19 }
  0x93   : > { %s824_s12 = sld [smem:[#allocation2 + $0x3]]  ;;  %v469_v48 = vand.u32 2147483647, %v461_v40  ;;  %v485_v49 = vmul.f32 0.5, %v461_v40  ;;  %v455_v52 = vld [vmem:[%s1421_s0 + $0x20] sm:$0xff]  ;;  %v456_v62 = vld [vmem:[%s1421_s0 + $0x28] sm:$0xff] }
  0x94   : > { %v533_v2 = vstv %s532_s2  ;;  %v467_v41 = vand.u32 2147483647, %v459_v36  ;;  %v483_v42 = vmul.f32 0.5, %v459_v36  ;;  %v468_v45 = vand.u32 2147483647, %v460_v39  ;;  %s1109_s29 = scalar_lea.hbm %s1533_s6, 16 }
  0x95   : > { %v534_v3 = vmul.f32 %v533_v2, %v531_v1  ;;  %v536_v4 = vstv %s822_s10  ;;  %v484_v46 = vmul.f32 0.5, %v460_v39  ;;  %v463_v57 = vsub.f32 %v447_v51, %v455_v52 }
  0x96   : > { %v547_v7 = vstv %s825_s18  ;;  %v491_v50 = vmul.f32 %v483_v42, %v459_v36  ;;  %vm1450_vm4 = vcmp.lt.f32.partialorder %v467_v41, 1.0  ;;  %vm1454_vm5 = vcmp.lt.f32.partialorder %v468_v45, 1.0 }
  0x97   : > { %v537_v6 = vadd.f32 %v536_v4, %v534_v3  ;;  %v548_v8 = vmul.f32 %v547_v7, %v545_v5  ;;  %v550_v9 = vstv %s826_s15  ;;  %v492_v55 = vmul.f32 %v484_v46, %v460_v39  ;;  %v449_v7 = vld [vmem:[%s1414_s8 + $0x30] sm:$0xff] }
  0x98   : > { %v540_v15 = vstv %s823_s14  ;;  %v814_v56 = vadd.f32 -0.5, %v467_v41  ;;  %v470_v58 = vand.u32 2147483647, %v462_v47  ;;  %v486_v59 = vmul.f32 0.5, %v462_v47 }
  0x99   : > { %v552_v10 = vmax.f32 %v537_v6, 0.1  ;;  %v551_v11 = vadd.f32 %v550_v9, %v548_v8  ;;  %v541_v16 = vmul.f32 %v540_v15, %v538_v14  ;;  %v543_v17 = vstv %s824_s12  ;;  %v457_v8 = vld [vmem:[%s1421_s0 + $0x30] sm:$0xff] }
  0x9a   : > { %v493_v60 = vmul.f32 %v485_v49, %v461_v40  ;;  %vm1460_vm6 = vcmp.lt.f32.partialorder %v469_v48, 1.0  ;;  %v815_v0 = vadd.f32 -0.5, %v468_v45  ;;  %v816_v1 = vadd.f32 -0.5, %v469_v48 }
  0x9b   : > { %v553_v12 = vmin.f32 %v552_v10, 25.0  ;;  %920 = vrcp.f32 %v551_v11  ;;  %v544_v20 = vadd.f32 %v543_v17, %v541_v16  ;;  %v568_v21 = vand.u32 2147483648, %v551_v11  ;;  %v450_v17 = vld [vmem:[%s1414_s8 + $0x38] sm:$0xff]  ;;  %s619_s8 = sshll.u32 %s615_s28, 4  ;;  %s620_s8 = int_to_ptr.hbm [resolvable:$true] %s619_s8 }
  0x9c   : > { %vm562_vm0 = vweird.f32 %v551_v11  ;;  %v566_v23 = vand.u32 2147483647, %v551_v11  ;;  %v507_v2 = vsel %vm1450_vm4, %v491_v50, %v814_v56  ;;  %v464_v3 = vsub.f32 %v448_v61, %v456_v62  ;;  %s1103_s13 = sshra.s32 %s620_s8, 4  ;;  %s1104_s13 = int_to_ptr.hbm [resolvable:$true] %s1103_s13 }
  0x9d   : > { %v554_v13 = vmul.f32 1.442695, %v553_v12  ;;  %v569_v26 = vor.u32 1.1754944e-38, %v568_v21  ;;  %v471_v4 = vand.u32 2147483647, %v463_v57  ;;  %v487_v5 = vmul.f32 0.5, %v463_v57  ;;  %p1110_p0 = scmp.lt.s32.totalorder %s1104_s13, %s1533_s6 }
  0x9e   : > { %vm567_vm3 = vcmp.eq.f32.partialorder %v566_v23, 8.507059e+37  ;;  %v494_v6 = vmul.f32 %v486_v59, %v462_v47  ;;  %vm1468_vm7 = vcmp.lt.f32.partialorder %v470_v58, 1.0  ;;  %v817_v10 = vadd.f32 -0.5, %v470_v58 }
  0x9f   : > { %922 = vpow2.f32 %v554_v13  ;;  %v509_v12 = vsel %vm1460_vm6, %v493_v60, %v816_v1  ;;  %v465_v13 = vsub.f32 %v449_v7, %v457_v8  ;;  %v472_v14 = vand.u32 2147483647, %v464_v3 }
  0xa0   : > { %v488_v15 = vmul.f32 0.5, %v464_v3  ;;  %v495_v16 = vmul.f32 %v487_v5, %v463_v57  ;;  %vm1478_vm8 = vcmp.lt.f32.partialorder %v471_v4, 1.0  ;;  %v510_v21 = vsel %vm1468_vm7, %v494_v6, %v817_v10 }
  0xa1   : > { %v921_v18 = vpop.eup %920  ;;  %vm1484_vm9 = vcmp.lt.f32.partialorder %v472_v14, 1.0  ;;  %v578_v46 = vlaneseq }
  0xa2   : > { %v558_v19 = vmul.f32 %v921_v18, %v551_v11  ;;  %vm563_vm1 = vweird.f32 %v921_v18  ;;  %v508_v11 = vsel %vm1454_vm5, %v492_v55, %v815_v0 }
  0xa3   : > { %vm564_vm2 = vmor %vm562_vm0, %vm563_vm1  ;;  %v579_v47 = vand.u32 127, %v578_v46  ;;  %v593_v1 = vshrl.u32 %v578_v46, 7 }
  0xa4   : > { %v559_v22 = vsub.f32 1.0, %v558_v19 }
  0xa5   : > { %v923_v24 = vpop.eup %922  ;;  %vm580_vm12 = vcmp.ge.s32.totalorder %v579_v47, 19  ;;  %vm594_vm13 = vcmp.eq.s32.totalorder %v593_v1, 0  ;;  %vm597_vm14 = vcmp.eq.s32.totalorder %v579_v47, 1  ;;  %vm595_vm15 = vcmp.eq.s32.totalorder %v579_v47, 0 }
  0xa6   : > { %v560_v25 = vmul.f32 %v921_v18, %v559_v22  ;;  %v556_v27 = vmul.f32 %v923_v24, %v544_v20  ;;  %v818_v20 = vadd.f32 -0.5, %v471_v4  ;;  %v515_v22 = vadd.f32 %v508_v11, %v507_v2  ;;  %vm598_vm0 = vmand %vm594_vm13, %vm597_vm14 }
  0xa7   : > { %v473_v24 = vand.u32 2147483647, %v465_v13  ;;  %vm596_vm1 = vmand %vm594_vm13, %vm595_vm15 }
  0xa8   : > { %v561_v28 = vadd.f32 %v921_v18, %v560_v25  ;;  %v489_v25 = vmul.f32 0.5, %v465_v13 }
  0xa9   : > { %v820_v35 = vadd.f32 -0.5, %v473_v24  ;;  %vm481_vm10 = vcmp.lt.f32.partialorder %v473_v24, 1.0 }
  0xaa   : > { %v565_v29 = vsel %vm564_vm2, %v921_v18, %v561_v28  ;;  %v458_v18 = vld [vmem:[%s1421_s0 + $0x38] sm:$0xff]  ;;  %v819_v28 = vadd.f32 -0.5, %v472_v14  ;;  %v497_v34 = vmul.f32 %v489_v25, %v465_v13  ;;  %s1105_s0 = scalar_lea.hbm %s1104_s13, 8 }
  0xab   : > { %v570_v30 = vsel %vm567_vm3, %v569_v26, %v565_v29  ;;  %v466_v23 = vsub.f32 %v450_v17, %v458_v18  ;;  %v496_v26 = vmul.f32 %v488_v15, %v464_v3  ;;  %v511_v29 = vsel %vm1478_vm8, %v495_v16, %v818_v20  ;;  %p1106_p6 = scmp.ne.s32.totalorder %s1104_s13, %s1105_s0  ;;  %p1111_p3 = scmp.lt.s32.totalorder %s1109_s29, %s1105_s0 }
  0xac   : > { %v1437_v31 = vmul.f32 %v570_v30, %v556_v27  ;;  %v516_v30 = vadd.f32 %v515_v22, %v509_v12  ;;  %v513_v41 = vsel %vm481_vm10, %v497_v34, %v820_v35 }
  0xad   : > { %v474_v32 = vand.u32 2147483647, %v466_v23  ;;  %v490_v33 = vmul.f32 0.5, %v466_v23  ;;  %v512_v39 = vsel %vm1484_vm9, %v496_v26, %v819_v28  ;;  %p1107_p5 = pnand %p1106_p6, %p1330_p7  ;;  %p1112_p13 = por %p1111_p3, %p1110_p0 }
  0xae   : > { %574 = vperm.xlu0 %919, %v1437_v31   ;;  %v517_v36 = vadd.f32 %v516_v30, %v510_v21 }
  0xaf   : > { %v498_v37 = vmul.f32 %v490_v33, %v466_v23  ;;  %v821_v38 = vadd.f32 -0.5, %v474_v32  ;;  %vm482_vm11 = vcmp.lt.f32.partialorder %v474_v32, 1.0  ;;  %p1108_p11 = pneg %p1107_p5 }
  0xb0   : > { %v518_v40 = vadd.f32 %v517_v36, %v511_v29 }
  0xb1   : > { %v514_v43 = vsel %vm482_vm11, %v498_v37, %v821_v38  ;;  %p1113_p12 = pnand %p1112_p13, %p1108_p11 }
  0xb2   : > { %v519_v42 = vadd.f32 %v518_v40, %v512_v39 }
  0xb4   : > { %v520_v44 = vadd.f32 %v519_v42, %v513_v41 }
  0xb6   : > { %v521_v45 = vadd.f32 %v520_v44, %v514_v43 }
  0xd8   : > { %522 = vadd.xlane.f32.xlu0 %v521_v45 }
 0x120   : > { %v575_v48 = vpop.permute.xlu0 %574 }
 0x121   : > { %v577_v49 = vsub.f32 %v1437_v31, %v575_v48 }
 0x123   : > { %v581_v50 = vmul.f32 %v577_v49, %v577_v49 }
 0x125   : > { %v582_v51 = vsel %vm580_vm12, %v581_v50, 0.0 }
 0x126   : > { %583 = vadd.xlane.f32.xlu1 %v582_v51 }
 0x14b   : > { %v523_v52 = vpop.xlane.xlu0 %522 }
 0x14c   : > { %v524_v53 = vrot.slane %v523_v52, 4 }
 0x14e   : > { %v525_v54 = vadd.f32 %v524_v53, %v523_v52 }
 0x150   : > { %v526_v55 = vrot.slane %v525_v54, 2 }
 0x152   : > { %v527_v56 = vadd.f32 %v526_v55, %v525_v54 }
 0x154   : > { %v528_v57 = vrot.slane %v527_v56, 1 }
 0x156   : > { %v529_v58 = vadd.f32 %v528_v57, %v527_v56 }
 0x158   : > { %835 = vpush %v529_v58 }
 0x189   : > { %s836_s17 = spop %835 }
 0x18a   : > { %v601_v3 = vstv %s836_s17 }
 0x199   : > { %v584_v59 = vpop.xlane.xlu1 %583 }
 0x19a   : > { %v585_v60 = vrot.slane %v584_v59, 4 }
 0x19c   : > { %v586_v61 = vadd.f32 %v585_v60, %v584_v59 }
 0x19e   : > { %v587_v62 = vrot.slane %v586_v61, 2 }
 0x1a0   : > { %v588_v63 = vadd.f32 %v587_v62, %v586_v61 }
 0x1a2   : > { %v589_v31 = vrot.slane %v588_v63, 1 }
 0x1a4   : > { %v590_v0 = vadd.f32 %v589_v31, %v588_v63 }
 0x1a6   : > { %837 = vpush %v590_v0 }
 0x1d7   : > { %s838_s7 = spop %837 }
 0x1d8   : > { %v599_v2 = vstv %s838_s7 }
 0x1d9   : > { %v600_v4 = vsel %vm598_vm0, %v599_v2, 0.0 }
 0x1da   : > { %v602_v5 = vsel %vm596_vm1, %v601_v3, %v600_v4 }
 0x1db   : > { %603 = vst [vmem:[%s440_s25] sm:$0xff] %v602_v5 }
 0x1dc   : > { %1116 = shalt.err (!%p1113_p12)
}
 0x1dd   : > { %853 = dma.vmem_to_hbm [thread:$0]  (%p1330_p7), %s618_s20, 128, %s620_s8, %s605_s9  }
 0x1de PF: > { %s631_s2 = sand.u32 1, %s1155_s21   ;;  %p1580_p1 = scmp.ge.s32.totalorder %s1167_s24, 2 }
 0x1df   : > { %s632_s10 = scalar_lea.sflag [#allocation4], %s631_s2 }
 0x1e0   : > { %p876_p2 = pnand %p1580_p1, %p1334_p9 }
 0x1e2   : > { %p877_p4 = pneg %p876_p2 }
 0x1e4   : > { %1150 = dma.done.wait (%p877_p4), %s632_s10, 128  }
 0x1e5   : > { %1152 = vsyncadd (%p877_p4), %s632_s10, 4294967168  ;;  %s1581_s24 = sld [smem:[#allocation20_spill]]  ;;  %s1584_s21 = smov %s1159_s22 }
 0x1e6   : > { %s1582_s18 = sld [smem:[#allocation19_spill]] }
 0x1e7   : > { %s1583_s23 = sld [smem:[#allocation21_spill]] }
 0x1eb   : > { %p26_p8 = scmp.ge.s32.totalorder %s1581_s24, 4  }
 0x1ec   : > { %s1585_s22 = smov %s1582_s18 }
 0x1ed   :  { %28 = sbr.rel (!%p26_p8) target bundleno = 15 (0xf), region = 142 }
 0x1f2   :  { %638 = vsyncpa [#allocation3], 1 }
 0x1f3   :  { %640 = vsyncpa [#allocation3 + $0x1], 1 }
 0x1f4   :  { %641 = vsyncpa [#allocation8], 1 }
 0x1f5   :  { %643 = vsyncpa [#allocation8 + $0x1], 1 }
 0x1f6   :  { %644 = vsyncpa [#allocation11], 1 }
 0x1f7   :  { %646 = vsyncpa [#allocation11 + $0x1], 1 }
 0x1f8   :  { %647 = vsyncpa [#allocation4], 1 }
 0x1f9   :  { %649 = vsyncpa [#allocation4 + $0x1], 1 }
 0x1fa   :  { %650 = vsyncpa [#allocation5], 1 }
 0x1fb   :  { %652 = vsyncpa [#allocation5 + $0x1], 1 }

</bundles_post_ra>
